<compile_context>
chip_gen: v5e
topology: v5e:2x2
jax: 0.10.0
libtpu: 0.0.40
codegen_flags: <defaults>
</compile_context>

<pallas_src>
import jax
import jax.numpy as jnp
from jax.experimental import pallas as pl
from jax.experimental.pallas import tpu as pltpu


def relu_kernel(x_ref, o_ref):
    # Elementwise ReLU on the current VMEM tile (VPU op); scalar 0 avoids
    # materializing a zeros temp.
    o_ref[...] = jnp.maximum(x_ref[...], 0)


def relu_pallas(x, *, lanes=512, max_block_bytes=1 << 20):
    """ReLU over an arbitrary-shape tensor via a lane-dense, tiled Pallas kernel."""
    orig_shape = x.shape
    total = x.size
    itemsize = jnp.dtype(x.dtype).itemsize

    # Rows of the 2-D slab (last dim = `lanes`, a multiple of 128).
    rows = pl.cdiv(total, lanes)

    # Rows per block: target ~1 MiB per block (comfortably inside the scoped
    # VMEM budget on v5e/v6e/v7x even with double-buffered in+out), multiple
    # of 8 (sublane), at least 8, and never more than the (sublane-rounded)
    # total row count.
    max_tile_rows = max(8, (max_block_bytes // (lanes * itemsize)) // 8 * 8)
    tile_rows = min(max_tile_rows, ((rows + 7) // 8) * 8)

    # Pad the flat element count so the grid divides evenly (padding is
    # bounded by one block, and ReLU(0) == 0 so it is semantically inert).
    padded_rows = pl.cdiv(rows, tile_rows) * tile_rows
    pad = padded_rows * lanes - total

    flat = x.reshape(-1)
    if pad:
        flat = jnp.concatenate([flat, jnp.zeros((pad,), dtype=x.dtype)])
    x2d = flat.reshape(padded_rows, lanes)

    grid = (padded_rows // tile_rows,)
    out2d = pl.pallas_call(
        relu_kernel,
        out_shape=jax.ShapeDtypeStruct(x2d.shape, x2d.dtype),
        grid=grid,
        in_specs=[pl.BlockSpec((tile_rows, lanes), lambda i: (i, 0))],
        out_specs=pl.BlockSpec((tile_rows, lanes), lambda i: (i, 0)),
        compiler_params=pltpu.CompilerParams(
            # Independent row tiles: lets v7x shard the grid across its two
            # TensorCores; neutral (and safe) on v5e/v6e.
            dimension_semantics=("parallel",),
        ),
    )(x2d)

    out_flat = out2d.reshape(-1)
    if pad:
        out_flat = out_flat[:total]
    return out_flat.reshape(orig_shape)


if __name__ == "__main__":
    # Module forward is ReLU(x); use the original (already small) activation
    # shape [1, 1024, 14, 14] => 200704 f32 elements (~0.8 MiB).
    key = jax.random.PRNGKey(0)
    x = jax.random.normal(key, (1, 1024, 14, 14), dtype=jnp.float32)

    y = relu_pallas(x)
    jax.block_until_ready(y)

    # Sanity check against plain JAX reference.
    ref = jnp.maximum(x, 0.0)
    assert y.shape == x.shape and y.dtype == x.dtype
    assert bool(jnp.allclose(y, ref)), "ReLU mismatch vs reference"

    print("KERNEL_OK")
</pallas_src>

<mosaic_0001>
module attributes {stable_mosaic.version = 11 : i64} {
  func.func @relu_kernel(%arg0: i32, %arg1: memref<392x512xf32, #tpu.memory_space<vmem>>, %arg2: memref<392x512xf32, #tpu.memory_space<vmem>>) attributes {dimension_semantics = [#tpu.dimension_semantics<parallel>], iteration_bounds = array<i64: 1>, scalar_prefetch = 0 : i64, scratch_operands = 0 : i64, tpu.core_type = #tpu.core_type<tc>, window_params = [{transform_indices = @transform_0, window_bounds = array<i64: 392, 512>}, {transform_indices = @transform_1, window_bounds = array<i64: 392, 512>}]} {
    %c0 = arith.constant 0 : index
    %c0_0 = arith.constant 0 : index
    %0 = vector.load %arg1[%c0, %c0_0] : memref<392x512xf32, #tpu.memory_space<vmem>>, vector<392x512xf32>
    %cst = arith.constant 0.000000e+00 : f32
    %1 = vector.broadcast %cst : f32 to vector<392x512xf32>
    %2 = arith.maximumf %0, %1 : vector<392x512xf32>
    %c0_1 = arith.constant 0 : index
    %c0_2 = arith.constant 0 : index
    %3 = vector.load %arg2[%c0_1, %c0_2] : memref<392x512xf32, #tpu.memory_space<vmem>>, vector<392x512xf32>
    tpu.vector_store %arg2[%c0_1, %c0_2], %2 {strides = array<i32>} : memref<392x512xf32, #tpu.memory_space<vmem>>, vector<392x512xf32>,
    return
  }
  func.func @transform_0(%arg0: i32) -> (i32, i32) {
    %c0_i32 = arith.constant 0 : i32
    %c0_i32_0 = arith.constant 0 : i32
    return %arg0, %c0_i32 : i32, i32
  }
  func.func @transform_1(%arg0: i32) -> (i32, i32) {
    %c0_i32 = arith.constant 0 : i32
    %c0_i32_0 = arith.constant 0 : i32
    return %arg0, %c0_i32 : i32, i32
  }
}

</mosaic_0001>

<bundles_post_ra>
// kernel: tpu_custom_call.1
= control target key start
LH: loop header
LB: loop body
LE: loop exit
PB: predicated region body
PF: predicated region fallthrough
CT: control target
= control target key end

     0   :  { %6 = vsyncpa [#allocation3], 0  ;;  %s714_s0 = inlined_call_operand.hbm [shape: f32[392,512], index: 0, kind: input, shape index: {}]   ;;  %s715_s1 = inlined_call_operand.hbm [shape: f32[392,512], index: 1, kind: output, shape index: {}]  }
   0x1   :  { %7 = vsyncpa [#allocation4], 0  ;;  %s12_s8 = sshll.u32 %s714_s0, 4  ;;  %s688_s9 = smov [#allocation2]   ;;  %s13_s8 = int_to_ptr.hbm [resolvable:$true] %s12_s8 }
   0x2   :  { %s14_s10 = sshll.u32 %s688_s9, 4  ;;  %s689_s11 = smov 512   ;;  %s15_s10 = int_to_ptr.vmem [resolvable:$true] %s14_s10 }
   0x3   :  { %s690_s12 = smov 32  }
   0x4   :  { %20 = dma.hbm_to_vmem [thread:$0]  %s13_s8, 25088, %s15_s10, [#allocation3], %s689_s11, %s689_s11, %s690_s12  }
   0x5   :  { %684 = dma.done.wait [#allocation3], 25088  }
   0x6   :  { %685 = vsyncadd [#allocation3], 4294942208  ;;  %v25_v0 = vld [vmem:[#allocation2] sm:$0xff]  ;;  %v26_v1 = vld [vmem:[#allocation2 + $0x8] sm:$0xff]  ;;  %s691_s0 = smov [#allocation5]   ;;  %s619_s16 = sshll.u32 %s715_s1, 4  ;;  %s620_s16 = int_to_ptr.hbm [resolvable:$true] %s619_s16 }
   0x7   :  { %v27_v2 = vld [vmem:[#allocation2 + $0x10] sm:$0xff]  ;;  %v221_v3 = vmax.f32 %v25_v0, 0.0  ;;  %v222_v4 = vmax.f32 %v26_v1, 0.0  ;;  %v28_v6 = vld [vmem:[#allocation2 + $0x18] sm:$0xff]  ;;  %v29_v7 = vld [vmem:[#allocation2 + $0x20] sm:$0xff]  ;;  %s617_s13 = sshll.u32 %s691_s0, 4  ;;  %s618_s13 = int_to_ptr.vmem [resolvable:$true] %s617_s13 }
   0x8   :  { %v223_v5 = vmax.f32 %v27_v2, 0.0  ;;  %v30_v8 = vld [vmem:[#allocation2 + $0x28] sm:$0xff]  ;;  %v224_v9 = vmax.f32 %v28_v6, 0.0  ;;  %v31_v10 = vld [vmem:[#allocation2 + $0x30] sm:$0xff]  ;;  %v225_v11 = vmax.f32 %v29_v7, 0.0  ;;  %v32_v12 = vld [vmem:[#allocation2 + $0x38] sm:$0xff] }
   0x9   :  { %417 = vst [vmem:[#allocation5] sm:$0xff] %v221_v3  ;;  %v226_v13 = vmax.f32 %v30_v8, 0.0  ;;  %v33_v14 = vld [vmem:[#allocation2 + $0x40] sm:$0xff]  ;;  %v227_v15 = vmax.f32 %v31_v10, 0.0  ;;  %v34_v16 = vld [vmem:[#allocation2 + $0x48] sm:$0xff]  ;;  %v228_v17 = vmax.f32 %v32_v12, 0.0 }
   0xa   :  { %418 = vst [vmem:[#allocation5 + $0x8] sm:$0xff] %v222_v4  ;;  %v35_v18 = vld [vmem:[#allocation2 + $0x50] sm:$0xff]  ;;  %v229_v19 = vmax.f32 %v33_v14, 0.0  ;;  %v36_v20 = vld [vmem:[#allocation2 + $0x58] sm:$0xff]  ;;  %v230_v21 = vmax.f32 %v34_v16, 0.0  ;;  %v37_v22 = vld [vmem:[#allocation2 + $0x60] sm:$0xff] }
   0xb   :  { %419 = vst [vmem:[#allocation5 + $0x10] sm:$0xff] %v223_v5  ;;  %v231_v23 = vmax.f32 %v35_v18, 0.0  ;;  %v38_v24 = vld [vmem:[#allocation2 + $0x68] sm:$0xff]  ;;  %v232_v25 = vmax.f32 %v36_v20, 0.0  ;;  %v39_v26 = vld [vmem:[#allocation2 + $0x70] sm:$0xff]  ;;  %v233_v27 = vmax.f32 %v37_v22, 0.0 }
   0xc   :  { %420 = vst [vmem:[#allocation5 + $0x18] sm:$0xff] %v224_v9  ;;  %v40_v28 = vld [vmem:[#allocation2 + $0x78] sm:$0xff]  ;;  %v234_v29 = vmax.f32 %v38_v24, 0.0  ;;  %v41_v30 = vld [vmem:[#allocation2 + $0x80] sm:$0xff]  ;;  %v235_v31 = vmax.f32 %v39_v26, 0.0  ;;  %v42_v32 = vld [vmem:[#allocation2 + $0x88] sm:$0xff] }
   0xd   :  { %421 = vst [vmem:[#allocation5 + $0x20] sm:$0xff] %v225_v11  ;;  %v236_v33 = vmax.f32 %v40_v28, 0.0  ;;  %v43_v34 = vld [vmem:[#allocation2 + $0x90] sm:$0xff]  ;;  %v237_v35 = vmax.f32 %v41_v30, 0.0  ;;  %v44_v36 = vld [vmem:[#allocation2 + $0x98] sm:$0xff]  ;;  %v238_v37 = vmax.f32 %v42_v32, 0.0 }
   0xe   :  { %422 = vst [vmem:[#allocation5 + $0x28] sm:$0xff] %v226_v13  ;;  %v45_v38 = vld [vmem:[#allocation2 + $0xa0] sm:$0xff]  ;;  %v239_v39 = vmax.f32 %v43_v34, 0.0  ;;  %v46_v40 = vld [vmem:[#allocation2 + $0xa8] sm:$0xff]  ;;  %v240_v41 = vmax.f32 %v44_v36, 0.0  ;;  %v47_v42 = vld [vmem:[#allocation2 + $0xb0] sm:$0xff] }
   0xf   :  { %423 = vst [vmem:[#allocation5 + $0x30] sm:$0xff] %v227_v15  ;;  %v241_v43 = vmax.f32 %v45_v38, 0.0  ;;  %v48_v44 = vld [vmem:[#allocation2 + $0xb8] sm:$0xff]  ;;  %v242_v45 = vmax.f32 %v46_v40, 0.0  ;;  %v49_v46 = vld [vmem:[#allocation2 + $0xc0] sm:$0xff]  ;;  %v243_v47 = vmax.f32 %v47_v42, 0.0 }
  0x10   :  { %424 = vst [vmem:[#allocation5 + $0x38] sm:$0xff] %v228_v17  ;;  %v50_v48 = vld [vmem:[#allocation2 + $0xc8] sm:$0xff]  ;;  %v244_v49 = vmax.f32 %v48_v44, 0.0  ;;  %v51_v50 = vld [vmem:[#allocation2 + $0xd0] sm:$0xff]  ;;  %v245_v51 = vmax.f32 %v49_v46, 0.0  ;;  %v52_v52 = vld [vmem:[#allocation2 + $0xd8] sm:$0xff] }
  0x11   :  { %425 = vst [vmem:[#allocation5 + $0x40] sm:$0xff] %v229_v19  ;;  %v246_v53 = vmax.f32 %v50_v48, 0.0  ;;  %v53_v54 = vld [vmem:[#allocation2 + $0xe0] sm:$0xff]  ;;  %v247_v55 = vmax.f32 %v51_v50, 0.0  ;;  %v54_v56 = vld [vmem:[#allocation2 + $0xe8] sm:$0xff]  ;;  %v248_v57 = vmax.f32 %v52_v52, 0.0 }
  0x12   :  { %426 = vst [vmem:[#allocation5 + $0x48] sm:$0xff] %v230_v21  ;;  %v55_v58 = vld [vmem:[#allocation2 + $0xf0] sm:$0xff]  ;;  %v249_v59 = vmax.f32 %v53_v54, 0.0  ;;  %v56_v60 = vld [vmem:[#allocation2 + $0xf8] sm:$0xff]  ;;  %v250_v61 = vmax.f32 %v54_v56, 0.0  ;;  %v57_v62 = vld [vmem:[#allocation2 + $0x100] sm:$0xff] }
  0x13   :  { %427 = vst [vmem:[#allocation5 + $0x50] sm:$0xff] %v231_v23  ;;  %v251_v63 = vmax.f32 %v55_v58, 0.0  ;;  %v58_v0 = vld [vmem:[#allocation2 + $0x108] sm:$0xff]  ;;  %v252_v1 = vmax.f32 %v56_v60, 0.0  ;;  %v59_v2 = vld [vmem:[#allocation2 + $0x110] sm:$0xff]  ;;  %v253_v3 = vmax.f32 %v57_v62, 0.0 }
  0x14   :  { %428 = vst [vmem:[#allocation5 + $0x58] sm:$0xff] %v232_v25  ;;  %v60_v4 = vld [vmem:[#allocation2 + $0x118] sm:$0xff]  ;;  %v254_v5 = vmax.f32 %v58_v0, 0.0  ;;  %v61_v6 = vld [vmem:[#allocation2 + $0x120] sm:$0xff]  ;;  %v255_v7 = vmax.f32 %v59_v2, 0.0  ;;  %v62_v8 = vld [vmem:[#allocation2 + $0x128] sm:$0xff] }
  0x15   :  { %429 = vst [vmem:[#allocation5 + $0x60] sm:$0xff] %v233_v27  ;;  %v256_v9 = vmax.f32 %v60_v4, 0.0  ;;  %v63_v10 = vld [vmem:[#allocation2 + $0x130] sm:$0xff]  ;;  %v257_v11 = vmax.f32 %v61_v6, 0.0  ;;  %v64_v12 = vld [vmem:[#allocation2 + $0x138] sm:$0xff]  ;;  %v258_v13 = vmax.f32 %v62_v8, 0.0 }
  0x16   :  { %430 = vst [vmem:[#allocation5 + $0x68] sm:$0xff] %v234_v29  ;;  %v65_v14 = vld [vmem:[#allocation2 + $0x140] sm:$0xff]  ;;  %v259_v15 = vmax.f32 %v63_v10, 0.0  ;;  %v66_v16 = vld [vmem:[#allocation2 + $0x148] sm:$0xff]  ;;  %v260_v17 = vmax.f32 %v64_v12, 0.0  ;;  %v67_v18 = vld [vmem:[#allocation2 + $0x150] sm:$0xff] }
  0x17   :  { %431 = vst [vmem:[#allocation5 + $0x70] sm:$0xff] %v235_v31  ;;  %v261_v19 = vmax.f32 %v65_v14, 0.0  ;;  %v68_v20 = vld [vmem:[#allocation2 + $0x158] sm:$0xff]  ;;  %v262_v21 = vmax.f32 %v66_v16, 0.0  ;;  %v69_v22 = vld [vmem:[#allocation2 + $0x160] sm:$0xff]  ;;  %v263_v23 = vmax.f32 %v67_v18, 0.0 }
  0x18   :  { %432 = vst [vmem:[#allocation5 + $0x78] sm:$0xff] %v236_v33  ;;  %v70_v24 = vld [vmem:[#allocation2 + $0x168] sm:$0xff]  ;;  %v264_v25 = vmax.f32 %v68_v20, 0.0  ;;  %v71_v26 = vld [vmem:[#allocation2 + $0x170] sm:$0xff]  ;;  %v265_v27 = vmax.f32 %v69_v22, 0.0  ;;  %v72_v28 = vld [vmem:[#allocation2 + $0x178] sm:$0xff] }
  0x19   :  { %433 = vst [vmem:[#allocation5 + $0x80] sm:$0xff] %v237_v35  ;;  %v266_v29 = vmax.f32 %v70_v24, 0.0  ;;  %v73_v30 = vld [vmem:[#allocation2 + $0x180] sm:$0xff]  ;;  %v267_v31 = vmax.f32 %v71_v26, 0.0  ;;  %v74_v32 = vld [vmem:[#allocation2 + $0x188] sm:$0xff]  ;;  %v268_v33 = vmax.f32 %v72_v28, 0.0 }
  0x1a   :  { %434 = vst [vmem:[#allocation5 + $0x88] sm:$0xff] %v238_v37  ;;  %v75_v34 = vld [vmem:[#allocation2 + $0x190] sm:$0xff]  ;;  %v269_v35 = vmax.f32 %v73_v30, 0.0  ;;  %v76_v36 = vld [vmem:[#allocation2 + $0x198] sm:$0xff]  ;;  %v270_v37 = vmax.f32 %v74_v32, 0.0  ;;  %v77_v38 = vld [vmem:[#allocation2 + $0x1a0] sm:$0xff] }
  0x1b   :  { %435 = vst [vmem:[#allocation5 + $0x90] sm:$0xff] %v239_v39  ;;  %v271_v39 = vmax.f32 %v75_v34, 0.0  ;;  %v78_v40 = vld [vmem:[#allocation2 + $0x1a8] sm:$0xff]  ;;  %v79_v42 = vld [vmem:[#allocation2 + $0x1b0] sm:$0xff]  ;;  %v80_v44 = vld [vmem:[#allocation2 + $0x1b8] sm:$0xff] }
  0x1c   :  { %436 = vst [vmem:[#allocation5 + $0x98] sm:$0xff] %v240_v41  ;;  %v272_v41 = vmax.f32 %v76_v36, 0.0  ;;  %v81_v46 = vld [vmem:[#allocation2 + $0x1c0] sm:$0xff]  ;;  %v82_v48 = vld [vmem:[#allocation2 + $0x1c8] sm:$0xff]  ;;  %v83_v50 = vld [vmem:[#allocation2 + $0x1d0] sm:$0xff] }
  0x1d   :  { %437 = vst [vmem:[#allocation5 + $0xa0] sm:$0xff] %v241_v43  ;;  %v273_v43 = vmax.f32 %v77_v38, 0.0  ;;  %v84_v52 = vld [vmem:[#allocation2 + $0x1d8] sm:$0xff]  ;;  %v85_v54 = vld [vmem:[#allocation2 + $0x1e0] sm:$0xff]  ;;  %v86_v56 = vld [vmem:[#allocation2 + $0x1e8] sm:$0xff] }
  0x1e   :  { %438 = vst [vmem:[#allocation5 + $0xa8] sm:$0xff] %v242_v45  ;;  %v274_v45 = vmax.f32 %v78_v40, 0.0  ;;  %v87_v58 = vld [vmem:[#allocation2 + $0x1f0] sm:$0xff]  ;;  %v88_v60 = vld [vmem:[#allocation2 + $0x1f8] sm:$0xff]  ;;  %v89_v62 = vld [vmem:[#allocation2 + $0x200] sm:$0xff] }
  0x1f   :  { %439 = vst [vmem:[#allocation5 + $0xb0] sm:$0xff] %v243_v47  ;;  %v275_v47 = vmax.f32 %v79_v42, 0.0  ;;  %v90_v0 = vld [vmem:[#allocation2 + $0x208] sm:$0xff]  ;;  %v91_v2 = vld [vmem:[#allocation2 + $0x210] sm:$0xff]  ;;  %v92_v4 = vld [vmem:[#allocation2 + $0x218] sm:$0xff] }
  0x20   :  { %440 = vst [vmem:[#allocation5 + $0xb8] sm:$0xff] %v244_v49  ;;  %v276_v49 = vmax.f32 %v80_v44, 0.0  ;;  %v93_v6 = vld [vmem:[#allocation2 + $0x220] sm:$0xff]  ;;  %v94_v8 = vld [vmem:[#allocation2 + $0x228] sm:$0xff]  ;;  %v95_v10 = vld [vmem:[#allocation2 + $0x230] sm:$0xff] }
  0x21   :  { %441 = vst [vmem:[#allocation5 + $0xc0] sm:$0xff] %v245_v51  ;;  %v277_v51 = vmax.f32 %v81_v46, 0.0  ;;  %v96_v12 = vld [vmem:[#allocation2 + $0x238] sm:$0xff]  ;;  %v97_v14 = vld [vmem:[#allocation2 + $0x240] sm:$0xff]  ;;  %v98_v16 = vld [vmem:[#allocation2 + $0x248] sm:$0xff] }
  0x22   :  { %442 = vst [vmem:[#allocation5 + $0xc8] sm:$0xff] %v246_v53  ;;  %v278_v53 = vmax.f32 %v82_v48, 0.0  ;;  %v99_v18 = vld [vmem:[#allocation2 + $0x250] sm:$0xff]  ;;  %v100_v20 = vld [vmem:[#allocation2 + $0x258] sm:$0xff]  ;;  %v101_v22 = vld [vmem:[#allocation2 + $0x260] sm:$0xff] }
  0x23   :  { %443 = vst [vmem:[#allocation5 + $0xd0] sm:$0xff] %v247_v55  ;;  %v279_v55 = vmax.f32 %v83_v50, 0.0  ;;  %v102_v24 = vld [vmem:[#allocation2 + $0x268] sm:$0xff]  ;;  %v103_v26 = vld [vmem:[#allocation2 + $0x270] sm:$0xff]  ;;  %v104_v28 = vld [vmem:[#allocation2 + $0x278] sm:$0xff] }
  0x24   :  { %444 = vst [vmem:[#allocation5 + $0xd8] sm:$0xff] %v248_v57  ;;  %v280_v57 = vmax.f32 %v84_v52, 0.0  ;;  %v105_v30 = vld [vmem:[#allocation2 + $0x280] sm:$0xff]  ;;  %v106_v32 = vld [vmem:[#allocation2 + $0x288] sm:$0xff]  ;;  %v107_v34 = vld [vmem:[#allocation2 + $0x290] sm:$0xff] }
  0x25   :  { %445 = vst [vmem:[#allocation5 + $0xe0] sm:$0xff] %v249_v59  ;;  %v281_v59 = vmax.f32 %v85_v54, 0.0  ;;  %v108_v36 = vld [vmem:[#allocation2 + $0x298] sm:$0xff]  ;;  %v109_v38 = vld [vmem:[#allocation2 + $0x2a0] sm:$0xff]  ;;  %v110_v40 = vld [vmem:[#allocation2 + $0x2a8] sm:$0xff] }
  0x26   :  { %446 = vst [vmem:[#allocation5 + $0xe8] sm:$0xff] %v250_v61  ;;  %v282_v61 = vmax.f32 %v86_v56, 0.0  ;;  %v111_v42 = vld [vmem:[#allocation2 + $0x2b0] sm:$0xff]  ;;  %v112_v44 = vld [vmem:[#allocation2 + $0x2b8] sm:$0xff]  ;;  %v113_v46 = vld [vmem:[#allocation2 + $0x2c0] sm:$0xff] }
  0x27   :  { %447 = vst [vmem:[#allocation5 + $0xf0] sm:$0xff] %v251_v63  ;;  %v283_v63 = vmax.f32 %v87_v58, 0.0  ;;  %v114_v48 = vld [vmem:[#allocation2 + $0x2c8] sm:$0xff]  ;;  %v115_v50 = vld [vmem:[#allocation2 + $0x2d0] sm:$0xff]  ;;  %v116_v52 = vld [vmem:[#allocation2 + $0x2d8] sm:$0xff] }
  0x28   :  { %448 = vst [vmem:[#allocation5 + $0xf8] sm:$0xff] %v252_v1  ;;  %v284_v1 = vmax.f32 %v88_v60, 0.0  ;;  %v117_v54 = vld [vmem:[#allocation2 + $0x2e0] sm:$0xff]  ;;  %v118_v56 = vld [vmem:[#allocation2 + $0x2e8] sm:$0xff]  ;;  %v119_v58 = vld [vmem:[#allocation2 + $0x2f0] sm:$0xff] }
  0x29   :  { %449 = vst [vmem:[#allocation5 + $0x100] sm:$0xff] %v253_v3  ;;  %v285_v3 = vmax.f32 %v89_v62, 0.0  ;;  %v120_v60 = vld [vmem:[#allocation2 + $0x2f8] sm:$0xff]  ;;  %v121_v62 = vld [vmem:[#allocation2 + $0x300] sm:$0xff] }
  0x2a   :  { %450 = vst [vmem:[#allocation5 + $0x108] sm:$0xff] %v254_v5  ;;  %v286_v5 = vmax.f32 %v90_v0, 0.0  ;;  %v122_v0 = vld [vmem:[#allocation2 + $0x308] sm:$0xff] }
  0x2b   :  { %451 = vst [vmem:[#allocation5 + $0x110] sm:$0xff] %v255_v7  ;;  %v287_v7 = vmax.f32 %v91_v2, 0.0  ;;  %v123_v2 = vld [vmem:[#allocation2 + $0x310] sm:$0xff] }
  0x2c   :  { %452 = vst [vmem:[#allocation5 + $0x118] sm:$0xff] %v256_v9  ;;  %v288_v9 = vmax.f32 %v92_v4, 0.0  ;;  %v124_v4 = vld [vmem:[#allocation2 + $0x318] sm:$0xff] }
  0x2d   :  { %453 = vst [vmem:[#allocation5 + $0x120] sm:$0xff] %v257_v11  ;;  %v289_v11 = vmax.f32 %v93_v6, 0.0  ;;  %v125_v6 = vld [vmem:[#allocation2 + $0x320] sm:$0xff] }
  0x2e   :  { %454 = vst [vmem:[#allocation5 + $0x128] sm:$0xff] %v258_v13  ;;  %v290_v13 = vmax.f32 %v94_v8, 0.0  ;;  %v126_v8 = vld [vmem:[#allocation2 + $0x328] sm:$0xff] }
  0x2f   :  { %455 = vst [vmem:[#allocation5 + $0x130] sm:$0xff] %v259_v15  ;;  %v291_v15 = vmax.f32 %v95_v10, 0.0  ;;  %v127_v10 = vld [vmem:[#allocation2 + $0x330] sm:$0xff] }
  0x30   :  { %456 = vst [vmem:[#allocation5 + $0x138] sm:$0xff] %v260_v17  ;;  %v292_v17 = vmax.f32 %v96_v12, 0.0  ;;  %v128_v12 = vld [vmem:[#allocation2 + $0x338] sm:$0xff] }
  0x31   :  { %457 = vst [vmem:[#allocation5 + $0x140] sm:$0xff] %v261_v19  ;;  %v293_v19 = vmax.f32 %v97_v14, 0.0  ;;  %v129_v14 = vld [vmem:[#allocation2 + $0x340] sm:$0xff] }
  0x32   :  { %458 = vst [vmem:[#allocation5 + $0x148] sm:$0xff] %v262_v21  ;;  %v294_v21 = vmax.f32 %v98_v16, 0.0  ;;  %v130_v16 = vld [vmem:[#allocation2 + $0x348] sm:$0xff] }
  0x33   :  { %459 = vst [vmem:[#allocation5 + $0x150] sm:$0xff] %v263_v23  ;;  %v295_v23 = vmax.f32 %v99_v18, 0.0  ;;  %v131_v18 = vld [vmem:[#allocation2 + $0x350] sm:$0xff] }
  0x34   :  { %460 = vst [vmem:[#allocation5 + $0x158] sm:$0xff] %v264_v25  ;;  %v296_v25 = vmax.f32 %v100_v20, 0.0  ;;  %v132_v20 = vld [vmem:[#allocation2 + $0x358] sm:$0xff] }
  0x35   :  { %461 = vst [vmem:[#allocation5 + $0x160] sm:$0xff] %v265_v27  ;;  %v297_v27 = vmax.f32 %v101_v22, 0.0  ;;  %v133_v22 = vld [vmem:[#allocation2 + $0x360] sm:$0xff] }
  0x36   :  { %462 = vst [vmem:[#allocation5 + $0x168] sm:$0xff] %v266_v29  ;;  %v298_v29 = vmax.f32 %v102_v24, 0.0  ;;  %v134_v24 = vld [vmem:[#allocation2 + $0x368] sm:$0xff] }
  0x37   :  { %463 = vst [vmem:[#allocation5 + $0x170] sm:$0xff] %v267_v31  ;;  %v299_v31 = vmax.f32 %v103_v26, 0.0  ;;  %v135_v26 = vld [vmem:[#allocation2 + $0x370] sm:$0xff] }
  0x38   :  { %464 = vst [vmem:[#allocation5 + $0x178] sm:$0xff] %v268_v33  ;;  %v300_v33 = vmax.f32 %v104_v28, 0.0  ;;  %v136_v28 = vld [vmem:[#allocation2 + $0x378] sm:$0xff] }
  0x39   :  { %465 = vst [vmem:[#allocation5 + $0x180] sm:$0xff] %v269_v35  ;;  %v301_v35 = vmax.f32 %v105_v30, 0.0  ;;  %v137_v30 = vld [vmem:[#allocation2 + $0x380] sm:$0xff] }
  0x3a   :  { %466 = vst [vmem:[#allocation5 + $0x188] sm:$0xff] %v270_v37  ;;  %v302_v37 = vmax.f32 %v106_v32, 0.0  ;;  %v138_v32 = vld [vmem:[#allocation2 + $0x388] sm:$0xff] }
  0x3b   :  { %467 = vst [vmem:[#allocation5 + $0x190] sm:$0xff] %v271_v39  ;;  %v303_v39 = vmax.f32 %v107_v34, 0.0  ;;  %v139_v34 = vld [vmem:[#allocation2 + $0x390] sm:$0xff] }
  0x3c   :  { %468 = vst [vmem:[#allocation5 + $0x198] sm:$0xff] %v272_v41  ;;  %v304_v41 = vmax.f32 %v108_v36, 0.0  ;;  %v140_v36 = vld [vmem:[#allocation2 + $0x398] sm:$0xff] }
  0x3d   :  { %469 = vst [vmem:[#allocation5 + $0x1a0] sm:$0xff] %v273_v43  ;;  %v305_v43 = vmax.f32 %v109_v38, 0.0  ;;  %v141_v38 = vld [vmem:[#allocation2 + $0x3a0] sm:$0xff] }
  0x3e   :  { %470 = vst [vmem:[#allocation5 + $0x1a8] sm:$0xff] %v274_v45  ;;  %v306_v45 = vmax.f32 %v110_v40, 0.0  ;;  %v142_v40 = vld [vmem:[#allocation2 + $0x3a8] sm:$0xff] }
  0x3f   :  { %471 = vst [vmem:[#allocation5 + $0x1b0] sm:$0xff] %v275_v47  ;;  %v307_v47 = vmax.f32 %v111_v42, 0.0  ;;  %v143_v42 = vld [vmem:[#allocation2 + $0x3b0] sm:$0xff] }
  0x40   :  { %472 = vst [vmem:[#allocation5 + $0x1b8] sm:$0xff] %v276_v49  ;;  %v308_v49 = vmax.f32 %v112_v44, 0.0  ;;  %v144_v44 = vld [vmem:[#allocation2 + $0x3b8] sm:$0xff] }
  0x41   :  { %473 = vst [vmem:[#allocation5 + $0x1c0] sm:$0xff] %v277_v51  ;;  %v309_v51 = vmax.f32 %v113_v46, 0.0  ;;  %v145_v46 = vld [vmem:[#allocation2 + $0x3c0] sm:$0xff] }
  0x42   :  { %474 = vst [vmem:[#allocation5 + $0x1c8] sm:$0xff] %v278_v53  ;;  %v310_v53 = vmax.f32 %v114_v48, 0.0  ;;  %v146_v48 = vld [vmem:[#allocation2 + $0x3c8] sm:$0xff] }
  0x43   :  { %475 = vst [vmem:[#allocation5 + $0x1d0] sm:$0xff] %v279_v55  ;;  %v311_v55 = vmax.f32 %v115_v50, 0.0  ;;  %v147_v50 = vld [vmem:[#allocation2 + $0x3d0] sm:$0xff] }
  0x44   :  { %476 = vst [vmem:[#allocation5 + $0x1d8] sm:$0xff] %v280_v57  ;;  %v312_v57 = vmax.f32 %v116_v52, 0.0  ;;  %v148_v52 = vld [vmem:[#allocation2 + $0x3d8] sm:$0xff] }
  0x45   :  { %477 = vst [vmem:[#allocation5 + $0x1e0] sm:$0xff] %v281_v59  ;;  %v313_v59 = vmax.f32 %v117_v54, 0.0  ;;  %v149_v54 = vld [vmem:[#allocation2 + $0x3e0] sm:$0xff] }
  0x46   :  { %478 = vst [vmem:[#allocation5 + $0x1e8] sm:$0xff] %v282_v61  ;;  %v314_v61 = vmax.f32 %v118_v56, 0.0  ;;  %v150_v56 = vld [vmem:[#allocation2 + $0x3e8] sm:$0xff] }
  0x47   :  { %479 = vst [vmem:[#allocation5 + $0x1f0] sm:$0xff] %v283_v63  ;;  %v315_v63 = vmax.f32 %v119_v58, 0.0  ;;  %v151_v58 = vld [vmem:[#allocation2 + $0x3f0] sm:$0xff] }
  0x48   :  { %480 = vst [vmem:[#allocation5 + $0x1f8] sm:$0xff] %v284_v1  ;;  %v316_v1 = vmax.f32 %v120_v60, 0.0  ;;  %v152_v60 = vld [vmem:[#allocation2 + $0x3f8] sm:$0xff] }
  0x49   :  { %481 = vst [vmem:[#allocation5 + $0x200] sm:$0xff] %v285_v3  ;;  %v317_v3 = vmax.f32 %v121_v62, 0.0  ;;  %v153_v62 = vld [vmem:[#allocation2 + $0x400] sm:$0xff] }
  0x4a   :  { %482 = vst [vmem:[#allocation5 + $0x208] sm:$0xff] %v286_v5  ;;  %v318_v5 = vmax.f32 %v122_v0, 0.0  ;;  %v154_v0 = vld [vmem:[#allocation2 + $0x408] sm:$0xff] }
  0x4b   :  { %483 = vst [vmem:[#allocation5 + $0x210] sm:$0xff] %v287_v7  ;;  %v319_v7 = vmax.f32 %v123_v2, 0.0  ;;  %v155_v2 = vld [vmem:[#allocation2 + $0x410] sm:$0xff] }
  0x4c   :  { %484 = vst [vmem:[#allocation5 + $0x218] sm:$0xff] %v288_v9  ;;  %v320_v9 = vmax.f32 %v124_v4, 0.0  ;;  %v156_v4 = vld [vmem:[#allocation2 + $0x418] sm:$0xff] }
  0x4d   :  { %485 = vst [vmem:[#allocation5 + $0x220] sm:$0xff] %v289_v11  ;;  %v321_v11 = vmax.f32 %v125_v6, 0.0  ;;  %v157_v6 = vld [vmem:[#allocation2 + $0x420] sm:$0xff] }
  0x4e   :  { %486 = vst [vmem:[#allocation5 + $0x228] sm:$0xff] %v290_v13  ;;  %v322_v13 = vmax.f32 %v126_v8, 0.0  ;;  %v158_v8 = vld [vmem:[#allocation2 + $0x428] sm:$0xff] }
  0x4f   :  { %487 = vst [vmem:[#allocation5 + $0x230] sm:$0xff] %v291_v15  ;;  %v323_v15 = vmax.f32 %v127_v10, 0.0  ;;  %v159_v10 = vld [vmem:[#allocation2 + $0x430] sm:$0xff] }
  0x50   :  { %488 = vst [vmem:[#allocation5 + $0x238] sm:$0xff] %v292_v17  ;;  %v324_v17 = vmax.f32 %v128_v12, 0.0  ;;  %v160_v12 = vld [vmem:[#allocation2 + $0x438] sm:$0xff] }
  0x51   :  { %489 = vst [vmem:[#allocation5 + $0x240] sm:$0xff] %v293_v19  ;;  %v325_v19 = vmax.f32 %v129_v14, 0.0  ;;  %v161_v14 = vld [vmem:[#allocation2 + $0x440] sm:$0xff] }
  0x52   :  { %490 = vst [vmem:[#allocation5 + $0x248] sm:$0xff] %v294_v21  ;;  %v326_v21 = vmax.f32 %v130_v16, 0.0  ;;  %v162_v16 = vld [vmem:[#allocation2 + $0x448] sm:$0xff] }
  0x53   :  { %491 = vst [vmem:[#allocation5 + $0x250] sm:$0xff] %v295_v23  ;;  %v327_v23 = vmax.f32 %v131_v18, 0.0  ;;  %v163_v18 = vld [vmem:[#allocation2 + $0x450] sm:$0xff] }
  0x54   :  { %492 = vst [vmem:[#allocation5 + $0x258] sm:$0xff] %v296_v25  ;;  %v328_v25 = vmax.f32 %v132_v20, 0.0  ;;  %v164_v20 = vld [vmem:[#allocation2 + $0x458] sm:$0xff] }
  0x55   :  { %493 = vst [vmem:[#allocation5 + $0x260] sm:$0xff] %v297_v27  ;;  %v329_v27 = vmax.f32 %v133_v22, 0.0  ;;  %v165_v22 = vld [vmem:[#allocation2 + $0x460] sm:$0xff] }
  0x56   :  { %494 = vst [vmem:[#allocation5 + $0x268] sm:$0xff] %v298_v29  ;;  %v330_v29 = vmax.f32 %v134_v24, 0.0  ;;  %v166_v24 = vld [vmem:[#allocation2 + $0x468] sm:$0xff] }
  0x57   :  { %495 = vst [vmem:[#allocation5 + $0x270] sm:$0xff] %v299_v31  ;;  %v331_v31 = vmax.f32 %v135_v26, 0.0  ;;  %v167_v26 = vld [vmem:[#allocation2 + $0x470] sm:$0xff] }
  0x58   :  { %496 = vst [vmem:[#allocation5 + $0x278] sm:$0xff] %v300_v33  ;;  %v332_v33 = vmax.f32 %v136_v28, 0.0  ;;  %v168_v28 = vld [vmem:[#allocation2 + $0x478] sm:$0xff] }
  0x59   :  { %497 = vst [vmem:[#allocation5 + $0x280] sm:$0xff] %v301_v35  ;;  %v333_v35 = vmax.f32 %v137_v30, 0.0  ;;  %v169_v30 = vld [vmem:[#allocation2 + $0x480] sm:$0xff] }
  0x5a   :  { %498 = vst [vmem:[#allocation5 + $0x288] sm:$0xff] %v302_v37  ;;  %v334_v37 = vmax.f32 %v138_v32, 0.0  ;;  %v170_v32 = vld [vmem:[#allocation2 + $0x488] sm:$0xff] }
  0x5b   :  { %499 = vst [vmem:[#allocation5 + $0x290] sm:$0xff] %v303_v39  ;;  %v335_v39 = vmax.f32 %v139_v34, 0.0  ;;  %v171_v34 = vld [vmem:[#allocation2 + $0x490] sm:$0xff] }
  0x5c   :  { %500 = vst [vmem:[#allocation5 + $0x298] sm:$0xff] %v304_v41  ;;  %v336_v41 = vmax.f32 %v140_v36, 0.0  ;;  %v172_v36 = vld [vmem:[#allocation2 + $0x498] sm:$0xff] }
  0x5d   :  { %501 = vst [vmem:[#allocation5 + $0x2a0] sm:$0xff] %v305_v43  ;;  %v337_v43 = vmax.f32 %v141_v38, 0.0  ;;  %v173_v38 = vld [vmem:[#allocation2 + $0x4a0] sm:$0xff] }
  0x5e   :  { %502 = vst [vmem:[#allocation5 + $0x2a8] sm:$0xff] %v306_v45  ;;  %v338_v45 = vmax.f32 %v142_v40, 0.0  ;;  %v174_v40 = vld [vmem:[#allocation2 + $0x4a8] sm:$0xff] }
  0x5f   :  { %503 = vst [vmem:[#allocation5 + $0x2b0] sm:$0xff] %v307_v47  ;;  %v339_v47 = vmax.f32 %v143_v42, 0.0  ;;  %v175_v42 = vld [vmem:[#allocation2 + $0x4b0] sm:$0xff] }
  0x60   :  { %504 = vst [vmem:[#allocation5 + $0x2b8] sm:$0xff] %v308_v49  ;;  %v340_v49 = vmax.f32 %v144_v44, 0.0  ;;  %v176_v44 = vld [vmem:[#allocation2 + $0x4b8] sm:$0xff] }
  0x61   :  { %505 = vst [vmem:[#allocation5 + $0x2c0] sm:$0xff] %v309_v51  ;;  %v341_v51 = vmax.f32 %v145_v46, 0.0  ;;  %v177_v46 = vld [vmem:[#allocation2 + $0x4c0] sm:$0xff] }
  0x62   :  { %506 = vst [vmem:[#allocation5 + $0x2c8] sm:$0xff] %v310_v53  ;;  %v342_v53 = vmax.f32 %v146_v48, 0.0  ;;  %v178_v48 = vld [vmem:[#allocation2 + $0x4c8] sm:$0xff] }
  0x63   :  { %507 = vst [vmem:[#allocation5 + $0x2d0] sm:$0xff] %v311_v55  ;;  %v343_v55 = vmax.f32 %v147_v50, 0.0  ;;  %v179_v50 = vld [vmem:[#allocation2 + $0x4d0] sm:$0xff] }
  0x64   :  { %508 = vst [vmem:[#allocation5 + $0x2d8] sm:$0xff] %v312_v57  ;;  %v344_v57 = vmax.f32 %v148_v52, 0.0  ;;  %v180_v52 = vld [vmem:[#allocation2 + $0x4d8] sm:$0xff] }
  0x65   :  { %509 = vst [vmem:[#allocation5 + $0x2e0] sm:$0xff] %v313_v59  ;;  %v345_v59 = vmax.f32 %v149_v54, 0.0  ;;  %v181_v54 = vld [vmem:[#allocation2 + $0x4e0] sm:$0xff] }
  0x66   :  { %510 = vst [vmem:[#allocation5 + $0x2e8] sm:$0xff] %v314_v61  ;;  %v346_v61 = vmax.f32 %v150_v56, 0.0  ;;  %v182_v56 = vld [vmem:[#allocation2 + $0x4e8] sm:$0xff] }
  0x67   :  { %511 = vst [vmem:[#allocation5 + $0x2f0] sm:$0xff] %v315_v63  ;;  %v347_v63 = vmax.f32 %v151_v58, 0.0  ;;  %v183_v58 = vld [vmem:[#allocation2 + $0x4f0] sm:$0xff] }
  0x68   :  { %512 = vst [vmem:[#allocation5 + $0x2f8] sm:$0xff] %v316_v1  ;;  %v348_v1 = vmax.f32 %v152_v60, 0.0  ;;  %v184_v60 = vld [vmem:[#allocation2 + $0x4f8] sm:$0xff] }
  0x69   :  { %513 = vst [vmem:[#allocation5 + $0x300] sm:$0xff] %v317_v3  ;;  %v349_v3 = vmax.f32 %v153_v62, 0.0  ;;  %v185_v62 = vld [vmem:[#allocation2 + $0x500] sm:$0xff] }
  0x6a   :  { %514 = vst [vmem:[#allocation5 + $0x308] sm:$0xff] %v318_v5  ;;  %v350_v5 = vmax.f32 %v154_v0, 0.0  ;;  %v186_v0 = vld [vmem:[#allocation2 + $0x508] sm:$0xff] }
  0x6b   :  { %515 = vst [vmem:[#allocation5 + $0x310] sm:$0xff] %v319_v7  ;;  %v351_v7 = vmax.f32 %v155_v2, 0.0  ;;  %v187_v2 = vld [vmem:[#allocation2 + $0x510] sm:$0xff] }
  0x6c   :  { %516 = vst [vmem:[#allocation5 + $0x318] sm:$0xff] %v320_v9  ;;  %v352_v9 = vmax.f32 %v156_v4, 0.0  ;;  %v188_v4 = vld [vmem:[#allocation2 + $0x518] sm:$0xff] }
  0x6d   :  { %517 = vst [vmem:[#allocation5 + $0x320] sm:$0xff] %v321_v11  ;;  %v353_v11 = vmax.f32 %v157_v6, 0.0  ;;  %v189_v6 = vld [vmem:[#allocation2 + $0x520] sm:$0xff] }
  0x6e   :  { %518 = vst [vmem:[#allocation5 + $0x328] sm:$0xff] %v322_v13  ;;  %v354_v13 = vmax.f32 %v158_v8, 0.0  ;;  %v190_v8 = vld [vmem:[#allocation2 + $0x528] sm:$0xff] }
  0x6f   :  { %519 = vst [vmem:[#allocation5 + $0x330] sm:$0xff] %v323_v15  ;;  %v355_v15 = vmax.f32 %v159_v10, 0.0  ;;  %v191_v10 = vld [vmem:[#allocation2 + $0x530] sm:$0xff] }
  0x70   :  { %520 = vst [vmem:[#allocation5 + $0x338] sm:$0xff] %v324_v17  ;;  %v356_v17 = vmax.f32 %v160_v12, 0.0  ;;  %v192_v12 = vld [vmem:[#allocation2 + $0x538] sm:$0xff] }
  0x71   :  { %521 = vst [vmem:[#allocation5 + $0x340] sm:$0xff] %v325_v19  ;;  %v357_v19 = vmax.f32 %v161_v14, 0.0  ;;  %v193_v14 = vld [vmem:[#allocation2 + $0x540] sm:$0xff] }
  0x72   :  { %522 = vst [vmem:[#allocation5 + $0x348] sm:$0xff] %v326_v21  ;;  %v358_v21 = vmax.f32 %v162_v16, 0.0  ;;  %v194_v16 = vld [vmem:[#allocation2 + $0x548] sm:$0xff] }
  0x73   :  { %523 = vst [vmem:[#allocation5 + $0x350] sm:$0xff] %v327_v23  ;;  %v359_v23 = vmax.f32 %v163_v18, 0.0  ;;  %v195_v18 = vld [vmem:[#allocation2 + $0x550] sm:$0xff] }
  0x74   :  { %524 = vst [vmem:[#allocation5 + $0x358] sm:$0xff] %v328_v25  ;;  %v360_v25 = vmax.f32 %v164_v20, 0.0  ;;  %v196_v20 = vld [vmem:[#allocation2 + $0x558] sm:$0xff] }
  0x75   :  { %525 = vst [vmem:[#allocation5 + $0x360] sm:$0xff] %v329_v27  ;;  %v361_v27 = vmax.f32 %v165_v22, 0.0  ;;  %v197_v22 = vld [vmem:[#allocation2 + $0x560] sm:$0xff] }
  0x76   :  { %526 = vst [vmem:[#allocation5 + $0x368] sm:$0xff] %v330_v29  ;;  %v362_v29 = vmax.f32 %v166_v24, 0.0  ;;  %v198_v24 = vld [vmem:[#allocation2 + $0x568] sm:$0xff] }
  0x77   :  { %527 = vst [vmem:[#allocation5 + $0x370] sm:$0xff] %v331_v31  ;;  %v363_v31 = vmax.f32 %v167_v26, 0.0  ;;  %v199_v26 = vld [vmem:[#allocation2 + $0x570] sm:$0xff] }
  0x78   :  { %528 = vst [vmem:[#allocation5 + $0x378] sm:$0xff] %v332_v33  ;;  %v364_v33 = vmax.f32 %v168_v28, 0.0  ;;  %v200_v28 = vld [vmem:[#allocation2 + $0x578] sm:$0xff] }
  0x79   :  { %529 = vst [vmem:[#allocation5 + $0x380] sm:$0xff] %v333_v35  ;;  %v365_v35 = vmax.f32 %v169_v30, 0.0  ;;  %v201_v30 = vld [vmem:[#allocation2 + $0x580] sm:$0xff] }
  0x7a   :  { %530 = vst [vmem:[#allocation5 + $0x388] sm:$0xff] %v334_v37  ;;  %v366_v37 = vmax.f32 %v170_v32, 0.0  ;;  %v202_v32 = vld [vmem:[#allocation2 + $0x588] sm:$0xff] }
  0x7b   :  { %531 = vst [vmem:[#allocation5 + $0x390] sm:$0xff] %v335_v39  ;;  %v367_v39 = vmax.f32 %v171_v34, 0.0  ;;  %v203_v34 = vld [vmem:[#allocation2 + $0x590] sm:$0xff] }
  0x7c   :  { %532 = vst [vmem:[#allocation5 + $0x398] sm:$0xff] %v336_v41  ;;  %v368_v41 = vmax.f32 %v172_v36, 0.0  ;;  %v204_v36 = vld [vmem:[#allocation2 + $0x598] sm:$0xff] }
  0x7d   :  { %533 = vst [vmem:[#allocation5 + $0x3a0] sm:$0xff] %v337_v43  ;;  %v369_v43 = vmax.f32 %v173_v38, 0.0  ;;  %v205_v38 = vld [vmem:[#allocation2 + $0x5a0] sm:$0xff] }
  0x7e   :  { %534 = vst [vmem:[#allocation5 + $0x3a8] sm:$0xff] %v338_v45  ;;  %v370_v45 = vmax.f32 %v174_v40, 0.0  ;;  %v206_v40 = vld [vmem:[#allocation2 + $0x5a8] sm:$0xff] }
  0x7f   :  { %535 = vst [vmem:[#allocation5 + $0x3b0] sm:$0xff] %v339_v47  ;;  %v371_v47 = vmax.f32 %v175_v42, 0.0  ;;  %v207_v42 = vld [vmem:[#allocation2 + $0x5b0] sm:$0xff] }
  0x80   :  { %536 = vst [vmem:[#allocation5 + $0x3b8] sm:$0xff] %v340_v49  ;;  %v372_v49 = vmax.f32 %v176_v44, 0.0  ;;  %v208_v44 = vld [vmem:[#allocation2 + $0x5b8] sm:$0xff] }
  0x81   :  { %537 = vst [vmem:[#allocation5 + $0x3c0] sm:$0xff] %v341_v51  ;;  %v373_v51 = vmax.f32 %v177_v46, 0.0  ;;  %v209_v46 = vld [vmem:[#allocation2 + $0x5c0] sm:$0xff] }
  0x82   :  { %538 = vst [vmem:[#allocation5 + $0x3c8] sm:$0xff] %v342_v53  ;;  %v374_v53 = vmax.f32 %v178_v48, 0.0  ;;  %v210_v48 = vld [vmem:[#allocation2 + $0x5c8] sm:$0xff] }
  0x83   :  { %539 = vst [vmem:[#allocation5 + $0x3d0] sm:$0xff] %v343_v55  ;;  %v375_v55 = vmax.f32 %v179_v50, 0.0  ;;  %v211_v50 = vld [vmem:[#allocation2 + $0x5d0] sm:$0xff] }
  0x84   :  { %540 = vst [vmem:[#allocation5 + $0x3d8] sm:$0xff] %v344_v57  ;;  %v376_v57 = vmax.f32 %v180_v52, 0.0  ;;  %v212_v52 = vld [vmem:[#allocation2 + $0x5d8] sm:$0xff] }
  0x85   :  { %541 = vst [vmem:[#allocation5 + $0x3e0] sm:$0xff] %v345_v59  ;;  %v377_v59 = vmax.f32 %v181_v54, 0.0  ;;  %v213_v54 = vld [vmem:[#allocation2 + $0x5e0] sm:$0xff] }
  0x86   :  { %542 = vst [vmem:[#allocation5 + $0x3e8] sm:$0xff] %v346_v61  ;;  %v378_v61 = vmax.f32 %v182_v56, 0.0  ;;  %v214_v56 = vld [vmem:[#allocation2 + $0x5e8] sm:$0xff] }
  0x87   :  { %543 = vst [vmem:[#allocation5 + $0x3f0] sm:$0xff] %v347_v63  ;;  %v379_v63 = vmax.f32 %v183_v58, 0.0  ;;  %v215_v58 = vld [vmem:[#allocation2 + $0x5f0] sm:$0xff] }
  0x88   :  { %544 = vst [vmem:[#allocation5 + $0x3f8] sm:$0xff] %v348_v1  ;;  %v380_v1 = vmax.f32 %v184_v60, 0.0  ;;  %v216_v60 = vld [vmem:[#allocation2 + $0x5f8] sm:$0xff] }
  0x89   :  { %545 = vst [vmem:[#allocation5 + $0x400] sm:$0xff] %v349_v3  ;;  %v381_v3 = vmax.f32 %v185_v62, 0.0  ;;  %v217_v62 = vld [vmem:[#allocation2 + $0x600] sm:$0xff] }
  0x8a   :  { %546 = vst [vmem:[#allocation5 + $0x408] sm:$0xff] %v350_v5  ;;  %v382_v5 = vmax.f32 %v186_v0, 0.0  ;;  %v218_v0 = vld [vmem:[#allocation2 + $0x608] sm:$0xff] }
  0x8b   :  { %547 = vst [vmem:[#allocation5 + $0x410] sm:$0xff] %v351_v7  ;;  %v383_v7 = vmax.f32 %v187_v2, 0.0  ;;  %v219_v2 = vld [vmem:[#allocation2 + $0x610] sm:$0xff] }
  0x8c   :  { %548 = vst [vmem:[#allocation5 + $0x418] sm:$0xff] %v352_v9  ;;  %v384_v9 = vmax.f32 %v188_v4, 0.0  ;;  %v220_v4 = vld [vmem:[#allocation2 + $0x618] sm:$0xff] }
  0x8d   :  { %549 = vst [vmem:[#allocation5 + $0x420] sm:$0xff] %v353_v11  ;;  %v385_v11 = vmax.f32 %v189_v6, 0.0  ;;  %v415_v6 = vmax.f32 %v219_v2, 0.0 }
  0x8e   :  { %550 = vst [vmem:[#allocation5 + $0x428] sm:$0xff] %v354_v13  ;;  %v386_v13 = vmax.f32 %v190_v8, 0.0 }
  0x8f   :  { %551 = vst [vmem:[#allocation5 + $0x430] sm:$0xff] %v355_v15  ;;  %v387_v15 = vmax.f32 %v191_v10, 0.0 }
  0x90   :  { %552 = vst [vmem:[#allocation5 + $0x438] sm:$0xff] %v356_v17  ;;  %v388_v17 = vmax.f32 %v192_v12, 0.0 }
  0x91   :  { %553 = vst [vmem:[#allocation5 + $0x440] sm:$0xff] %v357_v19  ;;  %v389_v19 = vmax.f32 %v193_v14, 0.0 }
  0x92   :  { %554 = vst [vmem:[#allocation5 + $0x448] sm:$0xff] %v358_v21  ;;  %v390_v21 = vmax.f32 %v194_v16, 0.0 }
  0x93   :  { %555 = vst [vmem:[#allocation5 + $0x450] sm:$0xff] %v359_v23  ;;  %v391_v23 = vmax.f32 %v195_v18, 0.0 }
  0x94   :  { %556 = vst [vmem:[#allocation5 + $0x458] sm:$0xff] %v360_v25  ;;  %v392_v25 = vmax.f32 %v196_v20, 0.0 }
  0x95   :  { %557 = vst [vmem:[#allocation5 + $0x460] sm:$0xff] %v361_v27  ;;  %v393_v27 = vmax.f32 %v197_v22, 0.0 }
  0x96   :  { %558 = vst [vmem:[#allocation5 + $0x468] sm:$0xff] %v362_v29  ;;  %v394_v29 = vmax.f32 %v198_v24, 0.0 }
  0x97   :  { %559 = vst [vmem:[#allocation5 + $0x470] sm:$0xff] %v363_v31  ;;  %v395_v31 = vmax.f32 %v199_v26, 0.0 }
  0x98   :  { %560 = vst [vmem:[#allocation5 + $0x478] sm:$0xff] %v364_v33  ;;  %v396_v33 = vmax.f32 %v200_v28, 0.0 }
  0x99   :  { %561 = vst [vmem:[#allocation5 + $0x480] sm:$0xff] %v365_v35  ;;  %v397_v35 = vmax.f32 %v201_v30, 0.0 }
  0x9a   :  { %562 = vst [vmem:[#allocation5 + $0x488] sm:$0xff] %v366_v37  ;;  %v398_v37 = vmax.f32 %v202_v32, 0.0 }
  0x9b   :  { %563 = vst [vmem:[#allocation5 + $0x490] sm:$0xff] %v367_v39  ;;  %v399_v39 = vmax.f32 %v203_v34, 0.0 }
  0x9c   :  { %564 = vst [vmem:[#allocation5 + $0x498] sm:$0xff] %v368_v41  ;;  %v400_v41 = vmax.f32 %v204_v36, 0.0 }
  0x9d   :  { %565 = vst [vmem:[#allocation5 + $0x4a0] sm:$0xff] %v369_v43  ;;  %v401_v43 = vmax.f32 %v205_v38, 0.0 }
  0x9e   :  { %566 = vst [vmem:[#allocation5 + $0x4a8] sm:$0xff] %v370_v45  ;;  %v402_v45 = vmax.f32 %v206_v40, 0.0 }
  0x9f   :  { %567 = vst [vmem:[#allocation5 + $0x4b0] sm:$0xff] %v371_v47  ;;  %v403_v47 = vmax.f32 %v207_v42, 0.0 }
  0xa0   :  { %568 = vst [vmem:[#allocation5 + $0x4b8] sm:$0xff] %v372_v49  ;;  %v404_v49 = vmax.f32 %v208_v44, 0.0 }
  0xa1   :  { %569 = vst [vmem:[#allocation5 + $0x4c0] sm:$0xff] %v373_v51  ;;  %v405_v51 = vmax.f32 %v209_v46, 0.0 }
  0xa2   :  { %570 = vst [vmem:[#allocation5 + $0x4c8] sm:$0xff] %v374_v53  ;;  %v406_v53 = vmax.f32 %v210_v48, 0.0 }
  0xa3   :  { %571 = vst [vmem:[#allocation5 + $0x4d0] sm:$0xff] %v375_v55  ;;  %v407_v55 = vmax.f32 %v211_v50, 0.0 }
  0xa4   :  { %572 = vst [vmem:[#allocation5 + $0x4d8] sm:$0xff] %v376_v57  ;;  %v408_v57 = vmax.f32 %v212_v52, 0.0 }
  0xa5   :  { %573 = vst [vmem:[#allocation5 + $0x4e0] sm:$0xff] %v377_v59  ;;  %v409_v59 = vmax.f32 %v213_v54, 0.0 }
  0xa6   :  { %574 = vst [vmem:[#allocation5 + $0x4e8] sm:$0xff] %v378_v61  ;;  %v410_v61 = vmax.f32 %v214_v56, 0.0 }
  0xa7   :  { %575 = vst [vmem:[#allocation5 + $0x4f0] sm:$0xff] %v379_v63  ;;  %v411_v63 = vmax.f32 %v215_v58, 0.0 }
  0xa8   :  { %576 = vst [vmem:[#allocation5 + $0x4f8] sm:$0xff] %v380_v1  ;;  %v412_v1 = vmax.f32 %v216_v60, 0.0 }
  0xa9   :  { %577 = vst [vmem:[#allocation5 + $0x500] sm:$0xff] %v381_v3  ;;  %v413_v3 = vmax.f32 %v217_v62, 0.0 }
  0xaa   :  { %578 = vst [vmem:[#allocation5 + $0x508] sm:$0xff] %v382_v5  ;;  %v414_v5 = vmax.f32 %v218_v0, 0.0 }
  0xab   :  { %579 = vst [vmem:[#allocation5 + $0x510] sm:$0xff] %v383_v7  ;;  %v416_v7 = vmax.f32 %v220_v4, 0.0 }
  0xac   :  { %580 = vst [vmem:[#allocation5 + $0x518] sm:$0xff] %v384_v9 }
  0xad   :  { %581 = vst [vmem:[#allocation5 + $0x520] sm:$0xff] %v385_v11 }
  0xae   :  { %582 = vst [vmem:[#allocation5 + $0x528] sm:$0xff] %v386_v13 }
  0xaf   :  { %583 = vst [vmem:[#allocation5 + $0x530] sm:$0xff] %v387_v15 }
  0xb0   :  { %584 = vst [vmem:[#allocation5 + $0x538] sm:$0xff] %v388_v17 }
  0xb1   :  { %585 = vst [vmem:[#allocation5 + $0x540] sm:$0xff] %v389_v19 }
  0xb2   :  { %586 = vst [vmem:[#allocation5 + $0x548] sm:$0xff] %v390_v21 }
  0xb3   :  { %587 = vst [vmem:[#allocation5 + $0x550] sm:$0xff] %v391_v23 }
  0xb4   :  { %588 = vst [vmem:[#allocation5 + $0x558] sm:$0xff] %v392_v25 }
  0xb5   :  { %589 = vst [vmem:[#allocation5 + $0x560] sm:$0xff] %v393_v27 }
  0xb6   :  { %590 = vst [vmem:[#allocation5 + $0x568] sm:$0xff] %v394_v29 }
  0xb7   :  { %591 = vst [vmem:[#allocation5 + $0x570] sm:$0xff] %v395_v31 }
  0xb8   :  { %592 = vst [vmem:[#allocation5 + $0x578] sm:$0xff] %v396_v33 }
  0xb9   :  { %593 = vst [vmem:[#allocation5 + $0x580] sm:$0xff] %v397_v35 }
  0xba   :  { %594 = vst [vmem:[#allocation5 + $0x588] sm:$0xff] %v398_v37 }
  0xbb   :  { %595 = vst [vmem:[#allocation5 + $0x590] sm:$0xff] %v399_v39 }
  0xbc   :  { %596 = vst [vmem:[#allocation5 + $0x598] sm:$0xff] %v400_v41 }
  0xbd   :  { %597 = vst [vmem:[#allocation5 + $0x5a0] sm:$0xff] %v401_v43 }
  0xbe   :  { %598 = vst [vmem:[#allocation5 + $0x5a8] sm:$0xff] %v402_v45 }
  0xbf   :  { %599 = vst [vmem:[#allocation5 + $0x5b0] sm:$0xff] %v403_v47 }
  0xc0   :  { %600 = vst [vmem:[#allocation5 + $0x5b8] sm:$0xff] %v404_v49 }
  0xc1   :  { %601 = vst [vmem:[#allocation5 + $0x5c0] sm:$0xff] %v405_v51 }
  0xc2   :  { %602 = vst [vmem:[#allocation5 + $0x5c8] sm:$0xff] %v406_v53 }
  0xc3   :  { %603 = vst [vmem:[#allocation5 + $0x5d0] sm:$0xff] %v407_v55 }
  0xc4   :  { %604 = vst [vmem:[#allocation5 + $0x5d8] sm:$0xff] %v408_v57 }
  0xc5   :  { %605 = vst [vmem:[#allocation5 + $0x5e0] sm:$0xff] %v409_v59 }
  0xc6   :  { %606 = vst [vmem:[#allocation5 + $0x5e8] sm:$0xff] %v410_v61 }
  0xc7   :  { %607 = vst [vmem:[#allocation5 + $0x5f0] sm:$0xff] %v411_v63 }
  0xc8   :  { %608 = vst [vmem:[#allocation5 + $0x5f8] sm:$0xff] %v412_v1 }
  0xc9   :  { %609 = vst [vmem:[#allocation5 + $0x600] sm:$0xff] %v413_v3 }
  0xca   :  { %610 = vst [vmem:[#allocation5 + $0x608] sm:$0xff] %v414_v5 }
  0xcb   :  { %611 = vst [vmem:[#allocation5 + $0x610] sm:$0xff] %v415_v6 }
  0xcc   :  { %612 = vst [vmem:[#allocation5 + $0x618] sm:$0xff] %v416_v7 }
  0xcd   :  { %625 = dma.vmem_to_hbm [thread:$0]  %s618_s13, 25088, %s620_s16, [#allocation4], %s689_s11, %s689_s11, %s690_s12  }
  0xce   :  { %686 = dma.done.wait [#allocation4], 25088  }
  0xcf   :  { %687 = vsyncadd [#allocation4], 4294942208 }
  0xd0   :  { %630 = vsyncpa [#allocation3], 1 }
  0xd1   :  { %631 = vsyncpa [#allocation4], 1 }

</bundles_post_ra>
